<compile_context>
chip_gen: v6e
topology: v6e:2x2x1
jax: 0.10.0
libtpu: 0.0.40
codegen_flags: <defaults>
</compile_context>

<pallas_src>
import math

import jax
import jax.numpy as jnp
from jax import lax
from jax.experimental import pallas as pl
from jax.experimental.pallas import tpu as pltpu


MARGIN = 0.2
SCALE = 30.0
EASY_MARGIN = False

COS_M = math.cos(MARGIN)
SIN_M = math.sin(MARGIN)
TH = math.cos(math.pi - MARGIN)
MM = math.sin(math.pi - MARGIN) * MARGIN

# Fill for padded class columns / batch rows: SCALE*fill stays finite in f32 and
# exp(fill - max) underflows to exactly 0, so padding never touches the lse.
_NEG_FILL = -1e30


def _aam_loss_kernel(labels_ref, logits_ref, loss_ref):
    """Per-row AAM-CE loss for one (tile_b, C_pad) block.

    labels_ref: (tile_b, 1)  int32 class labels
    logits_ref: (tile_b, C)  cosine similarities (native dtype)
    loss_ref:   (tile_b, 1)  f32 per-row loss
    """
    cosine = logits_ref[...].astype(jnp.float32)                  # (TB, C)
    labels = labels_ref[...]                                      # (TB, 1)
    col = lax.broadcasted_iota(jnp.int32, cosine.shape, 1)
    mask = col == labels                                          # (TB, C) one-hot

    # Gather the label-column cosine (exactly one hit per row) so the sqrt /
    # margin math runs on a (TB, 1) vector instead of the full tile.
    cos_y = jnp.sum(jnp.where(mask, cosine, 0.0), axis=1, keepdims=True)
    # max(., 0) only guards against |cosine| > 1 by a ULP (reference would NaN).
    sin_y = jnp.sqrt(jnp.maximum(1.0 - cos_y * cos_y, 0.0))
    phi_y = cos_y * COS_M - sin_y * SIN_M
    if EASY_MARGIN:
        phi_y = jnp.where(cos_y > 0.0, phi_y, cos_y)
    else:
        phi_y = jnp.where(cos_y > TH, phi_y, cos_y - MM)

    # Margin-adjusted logits: SCALE*cosine everywhere except the label column.
    out = SCALE * jnp.where(mask, phi_y, cosine)                  # (TB, C)

    # Per-row loss = -log_softmax(out)[label] = lse(out) - SCALE*phi_label.
    m = jnp.max(out, axis=1, keepdims=True)
    lse = m + jnp.log(jnp.sum(jnp.exp(out - m), axis=1, keepdims=True))
    loss_ref[...] = lse - SCALE * phi_y


def aam_loss(outputs, targets, *, max_block_elems=2 ** 21):
    """outputs: (B, C) cosine similarities; targets: (B,) int labels -> scalar loss."""
    B, C = outputs.shape
    labels = targets.astype(jnp.int32).reshape(B, 1)

    # Lane-dense class axis.
    C_pad = ((C + 127) // 128) * 128
    # Largest multiple-of-8 batch tile within the per-buffer element budget
    # (~8 MiB f32/buffer -> ~16 MiB double-buffered, safe on every generation).
    rows_budget = max(8, (max_block_elems // C_pad) // 8 * 8)
    tile_b = int(min(rows_budget, pl.cdiv(B, 8) * 8))
    B_pad = int(pl.cdiv(B, tile_b)) * tile_b

    x = outputs
    if (B_pad != B) or (C_pad != C):
        x = jnp.pad(
            x,
            ((0, B_pad - B), (0, C_pad - C)),
            constant_values=jnp.asarray(_NEG_FILL, x.dtype),
        )
    if B_pad != B:
        labels = jnp.pad(labels, ((0, B_pad - B), (0, 0)))

    per_row = pl.pallas_call(
        _aam_loss_kernel,
        out_shape=jax.ShapeDtypeStruct((B_pad, 1), jnp.float32),
        grid_spec=pltpu.PrefetchScalarGridSpec(
            num_scalar_prefetch=0,
            grid=(B_pad // tile_b,),
            in_specs=[
                # labels: tiny (4 B/row) side stream, negligible vs the logits DMA
                pl.BlockSpec((tile_b, 1), lambda i: (i, 0)),
                # logits in native dtype (cast to f32 inside the kernel)
                pl.BlockSpec((tile_b, C_pad), lambda i: (i, 0)),
            ],
            out_specs=pl.BlockSpec((tile_b, 1), lambda i: (i, 0)),
        ),
        compiler_params=pltpu.CompilerParams(
            dimension_semantics=("parallel",),          # independent row tiles
            vmem_limit_bytes=32 * 1024 * 1024,
        ),
    )(labels, x)

    # KLDivLoss(reduction='sum') with one-hot targets / targets.sum()
    #   == mean over rows of the per-row cross-entropy.
    return jnp.sum(per_row[:B, 0]) / jnp.float32(B)


def _aam_loss_ref(outputs, targets):
    """Pure-JAX reference mirroring the PyTorch module."""
    C = outputs.shape[1]
    t = jax.nn.one_hot(targets, C, dtype=jnp.float32)
    cosine = outputs.astype(jnp.float32)
    sine = jnp.sqrt(1.0 - cosine ** 2)
    phi = cosine * COS_M - sine * SIN_M
    if EASY_MARGIN:
        phi = jnp.where(cosine > 0.0, phi, cosine)
    else:
        phi = jnp.where(cosine > TH, phi, cosine - MM)
    pred = SCALE * (t * phi + (1.0 - t) * cosine)
    logp = jax.nn.log_softmax(pred, axis=1)
    # KLDivLoss(sum) with xlogy(0,0)=0
    kl = jnp.sum(jnp.where(t > 0, t * (jnp.log(jnp.where(t > 0, t, 1.0)) - logp), 0.0))
    return kl / jnp.sum(t)


if __name__ == "__main__":
    key = jax.random.PRNGKey(0)
    B, C = 16, 32   # small shapes: batch=16, num_classes=32
    k1, k2 = jax.random.split(key)
    # outputs are cosine similarities, keep them in [-1, 1]
    outputs = jax.random.uniform(k1, (B, C), jnp.float32, minval=-1.0, maxval=1.0)
    targets = jax.random.randint(k2, (B,), 0, C, jnp.int32)

    loss = aam_loss(outputs, targets)
    jax.block_until_ready(loss)

    ref = _aam_loss_ref(outputs, targets)
    assert jnp.allclose(loss, ref, rtol=1e-5, atol=1e-5), (loss, ref)
    print("KERNEL_OK")
</pallas_src>

<mosaic_0001>
module attributes {stable_mosaic.version = 11 : i64} {
  func.func @_aam_loss_kernel(%arg0: i32, %arg1: memref<16x1xi32, #tpu.memory_space<vmem>>, %arg2: memref<16x128xf32, #tpu.memory_space<vmem>>, %arg3: memref<16x1xf32, #tpu.memory_space<vmem>>) attributes {dimension_semantics = [#tpu.dimension_semantics<parallel>], iteration_bounds = array<i64: 1>, scalar_prefetch = 0 : i64, scratch_operands = 0 : i64, tpu.core_type = #tpu.core_type<tc>, window_params = [{transform_indices = @transform_0, window_bounds = array<i64: 16, 1>}, {transform_indices = @transform_1, window_bounds = array<i64: 16, 128>}, {transform_indices = @transform_2, window_bounds = array<i64: 16, 1>}]} {
    %c0 = arith.constant 0 : index
    %c0_0 = arith.constant 0 : index
    %0 = vector.load %arg2[%c0, %c0_0] : memref<16x128xf32, #tpu.memory_space<vmem>>, vector<16x128xf32>
    %c0_1 = arith.constant 0 : index
    %c0_2 = arith.constant 0 : index
    %1 = vector.load %arg1[%c0_1, %c0_2] : memref<16x1xi32, #tpu.memory_space<vmem>>, vector<16x1xi32>
    %2 = tpu.iota {dimensions = array<i32: 1>} : vector<16x128xi32>
    %3 = vector.broadcast %1 : vector<16x1xi32> to vector<16x128xi32>
    %4 = arith.cmpi eq, %2, %3 : vector<16x128xi32>
    %cst = arith.constant 0.000000e+00 : f32
    %5 = vector.broadcast %cst : f32 to vector<16x128xf32>
    %6 = arith.select %4, %0, %5 : vector<16x128xi1>, vector<16x128xf32>
    %cst_3 = arith.constant dense<0.000000e+00> : vector<16xf32>
    %7 = vector.multi_reduction <add>, %6, %cst_3 [1] : vector<16x128xf32> to vector<16xf32>
    %8 = vector.shape_cast %7 : vector<16xf32> to vector<16x1xf32>
    %9 = arith.mulf %8, %8 : vector<16x1xf32>
    %cst_4 = arith.constant 1.000000e+00 : f32
    %10 = vector.broadcast %cst_4 : f32 to vector<16x1xf32>
    %11 = arith.subf %10, %9 : vector<16x1xf32>
    %cst_5 = arith.constant 0.000000e+00 : f32
    %12 = vector.broadcast %cst_5 : f32 to vector<16x1xf32>
    %13 = arith.maximumf %11, %12 : vector<16x1xf32>
    %14 = math.sqrt %13 : vector<16x1xf32>
    %cst_6 = arith.constant 0.980066597 : f32
    %15 = vector.broadcast %cst_6 : f32 to vector<16x1xf32>
    %16 = arith.mulf %8, %15 : vector<16x1xf32>
    %cst_7 = arith.constant 0.198669329 : f32
    %17 = vector.broadcast %cst_7 : f32 to vector<16x1xf32>
    %18 = arith.mulf %14, %17 : vector<16x1xf32>
    %19 = arith.subf %16, %18 : vector<16x1xf32>
    %cst_8 = arith.constant -0.980066597 : f32
    %20 = vector.broadcast %cst_8 : f32 to vector<16x1xf32>
    %21 = arith.cmpf ogt, %8, %20 : vector<16x1xf32>
    %cst_9 = arith.constant 0.0397338644 : f32
    %22 = vector.broadcast %cst_9 : f32 to vector<16x1xf32>
    %23 = arith.subf %8, %22 : vector<16x1xf32>
    %24 = arith.select %21, %19, %23 : vector<16x1xi1>, vector<16x1xf32>
    %25 = vector.shape_cast %24 : vector<16x1xf32> to vector<16x1xf32>
    %26 = vector.broadcast %25 : vector<16x1xf32> to vector<16x128xf32>
    %27 = arith.select %4, %26, %0 : vector<16x128xi1>, vector<16x128xf32>
    %cst_10 = arith.constant 3.000000e+01 : f32
    %28 = vector.broadcast %cst_10 : f32 to vector<16x128xf32>
    %29 = arith.mulf %28, %27 : vector<16x128xf32>
    %cst_11 = arith.constant dense<0xFF800000> : vector<16xf32>
    %30 = vector.multi_reduction <maximumf>, %29, %cst_11 [1] : vector<16x128xf32> to vector<16xf32>
    %31 = vector.shape_cast %30 : vector<16xf32> to vector<16x1xf32>
    %32 = vector.broadcast %31 : vector<16x1xf32> to vector<16x128xf32>
    %33 = arith.subf %29, %32 : vector<16x128xf32>
    %34 = math.exp %33 : vector<16x128xf32>
    %cst_12 = arith.constant dense<0.000000e+00> : vector<16xf32>
    %35 = vector.multi_reduction <add>, %34, %cst_12 [1] : vector<16x128xf32> to vector<16xf32>
    %36 = vector.shape_cast %35 : vector<16xf32> to vector<16x1xf32>
    %37 = math.log %36 : vector<16x1xf32>
    %38 = arith.addf %31, %37 : vector<16x1xf32>
    %cst_13 = arith.constant 3.000000e+01 : f32
    %39 = vector.broadcast %cst_13 : f32 to vector<16x1xf32>
    %40 = arith.mulf %39, %24 : vector<16x1xf32>
    %41 = arith.subf %38, %40 : vector<16x1xf32>
    %c0_14 = arith.constant 0 : index
    %c0_15 = arith.constant 0 : index
    %42 = vector.load %arg3[%c0_14, %c0_15] : memref<16x1xf32, #tpu.memory_space<vmem>>, vector<16x1xf32>
    tpu.vector_store %arg3[%c0_14, %c0_15], %41 {strides = array<i32>} : memref<16x1xf32, #tpu.memory_space<vmem>>, vector<16x1xf32>,
    return
  }
  func.func @transform_0(%arg0: i32) -> (i32, i32) {
    %c0_i32 = arith.constant 0 : i32
    %c0_i32_0 = arith.constant 0 : i32
    return %arg0, %c0_i32 : i32, i32
  }
  func.func @transform_1(%arg0: i32) -> (i32, i32) {
    %c0_i32 = arith.constant 0 : i32
    %c0_i32_0 = arith.constant 0 : i32
    return %arg0, %c0_i32 : i32, i32
  }
  func.func @transform_2(%arg0: i32) -> (i32, i32) {
    %c0_i32 = arith.constant 0 : i32
    %c0_i32_0 = arith.constant 0 : i32
    return %arg0, %c0_i32 : i32, i32
  }
}

</mosaic_0001>

<bundles_post_ra>
// kernel: tpu_custom_call.1
= control target key start
LH: loop header
LB: loop body
LE: loop exit
PB: predicated region body
PF: predicated region fallthrough
CT: control target
= control target key end

     0   :  { %v114_v0 = vmov 0   ;;  %v15_v3 = vlaneseq  ;;  %vm91_vm8 = vcmask 7168   ;;  %s152_s0 = inlined_call_operand.vmem [shape: s32[16,1], index: 0, kind: input, shape index: {}]   ;;  %s153_s1 = inlined_call_operand.vmem [shape: f32[16,128], index: 1, kind: input, shape index: {}]   ;;  %s154_s2 = inlined_call_operand.vmem [shape: f32[16,1], index: 2, kind: output, shape index: {}]  }
   0x1   :  { %101 = vset.pattern.permute.xlu0 %v114_v0  ;;  %v13_v1 = vld [vmem:[%s152_s0] sm:$0xff]  ;;  %v14_v2 = vld [vmem:[%s152_s0 + $0x8] sm:$0xff] }
   0x2   :  { %18 = vperm.xlu0 %101, %v13_v1   ;;  %v16_v4 = vand.u32 127, %v15_v3  ;;  %v11_v5 = vld [vmem:[%s153_s1] sm:$0xff]  ;;  %v12_v8 = vld [vmem:[%s153_s1 + $0x8] sm:$0xff] }
   0x6   :  { %21 = vperm.xlu0 %101, %v14_v2  }
  0x7d   :  { %v19_v6 = vpop.permute.xlu0 %18 }
  0x7e   :  { %vm23_vm0 = vcmp.eq.s32.totalorder %v16_v4, %v19_v6 }
  0x7f   :  { %v25_v7 = vsel %vm23_vm0, %v11_v5, 0.0 }
  0x80   :  { %27 = vadd.xlane.f32.xlu1 %v25_v7 }
  0x81   :  { %v22_v9 = vpop.permute.xlu0 %21 }
  0x82   :  { %vm24_vm1 = vcmp.eq.s32.totalorder %v16_v4, %v22_v9 }
  0x83   :  { %v26_v10 = vsel %vm24_vm1, %v12_v8, 0.0 }
  0x84   :  { %29 = vadd.xlane.f32.xlu1 %v26_v10 }
 0x109   :  { %v28_v11 = vpop.xlane.xlu1 %27 }
 0x10a   :  { %v31_v12 = vmul.f32 %v28_v11, %v28_v11  ;;  %v51_v25 = vmul.f32 0.9800666, %v28_v11  ;;  %v98_v29 = vadd.f32 -0.039733864, %v28_v11  ;;  %vm57_vm5 = vcmp.gt.f32.partialorder %v28_v11, -0.9800666 }
 0x10c   :  { %v33_v13 = vsub.f32 1.0, %v31_v12 }
 0x10d   :  { %v30_v14 = vpop.xlane.xlu1 %29 }
 0x10e   :  { %v35_v15 = vmax.f32 %v33_v13, 0.0  ;;  %v32_v16 = vmul.f32 %v30_v14, %v30_v14  ;;  %v52_v34 = vmul.f32 0.9800666, %v30_v14  ;;  %v99_v39 = vadd.f32 -0.039733864, %v30_v14 }
 0x10f   :  { %vm58_vm7 = vcmp.gt.f32.partialorder %v30_v14, -0.9800666 }
 0x110   :  { %102 = vrsqrt.f32 %v35_v15  ;;  %v34_v17 = vsub.f32 1.0, %v32_v16  ;;  %vm39_vm2 = vcmp.eq.f32.partialorder %v35_v15, inf  ;;  %v42_v21 = vand.u32 2147483648, %v35_v15 }
 0x111   :  { %vm41_vm3 = vcmp.eq.f32.partialorder %v35_v15, 0.0 }
 0x112   :  { %v36_v18 = vmax.f32 %v34_v17, 0.0 }
 0x114   :  { %104 = vrsqrt.f32 %v36_v18  ;;  %vm46_vm4 = vcmp.eq.f32.partialorder %v36_v18, inf  ;;  %v49_v30 = vand.u32 2147483648, %v36_v18  ;;  %vm48_vm6 = vcmp.eq.f32.partialorder %v36_v18, 0.0 }
 0x11d   :  { %v103_v19 = vpop.eup %102 }
 0x11e   :  { %v38_v20 = vmul.f32 %v103_v19, %v35_v15 }
 0x120   :  { %v40_v22 = vsel %vm39_vm2, %v35_v15, %v38_v20 }
 0x121   :  { %v43_v23 = vsel %vm41_vm3, %v42_v21, %v40_v22  ;;  %v105_v24 = vpop.eup %104 }
 0x122   :  { %v53_v26 = vmul.f32 0.19866933, %v43_v23  ;;  %v45_v27 = vmul.f32 %v105_v24, %v36_v18 }
 0x124   :  { %v55_v28 = vsub.f32 %v51_v25, %v53_v26  ;;  %v47_v31 = vsel %vm46_vm4, %v36_v18, %v45_v27 }
 0x125   :  { %v50_v32 = vsel %vm48_vm6, %v49_v30, %v47_v31 }
 0x126   :  { %v61_v33 = vsel %vm57_vm5, %v55_v28, %v98_v29  ;;  %v54_v35 = vmul.f32 0.19866933, %v50_v32 }
 0x127   :  { %v63_v36 = vsel %vm23_vm0, %v61_v33, %v11_v5  ;;  %v87_v55 = vmul.f32 30.0, %v61_v33 }
 0x128   :  { %v65_v37 = vmul.f32 30.0, %v63_v36  ;;  %v56_v38 = vsub.f32 %v52_v34, %v54_v35 }
 0x12a   :  { %67 = vmax.xlane.f32.xlu0 %v65_v37  ;;  %v62_v40 = vsel %vm58_vm7, %v56_v38, %v99_v39 }
 0x12b   :  { %v64_v41 = vsel %vm24_vm1, %v62_v40, %v12_v8  ;;  %v88_v60 = vmul.f32 30.0, %v62_v40 }
 0x12c   :  { %v66_v42 = vmul.f32 30.0, %v64_v41 }
 0x12e   :  { %69 = vmax.xlane.f32.xlu1 %v66_v42 }
 0x1b3   :  { %v68_v43 = vpop.xlane.xlu0 %67 }
 0x1b4   :  { %v71_v44 = vsub.f32 %v65_v37, %v68_v43 }
 0x1b6   :  { %v73_v45 = vmul.f32 1.442695, %v71_v44 }
 0x1b7   :  { %v70_v46 = vpop.xlane.xlu1 %69 }
 0x1b8   :  { %106 = vpow2.f32 %v73_v45  ;;  %v72_v47 = vsub.f32 %v66_v42, %v70_v46 }
 0x1ba   :  { %v75_v48 = vmul.f32 1.442695, %v72_v47 }
 0x1bc   :  { %108 = vpow2.f32 %v75_v48 }
 0x1c5   :  { %v107_v49 = vpop.eup %106 }
 0x1c6   :  { %77 = vadd.xlane.f32.xlu1 %v107_v49 }
 0x1c9   :  { %v109_v50 = vpop.eup %108 }
 0x1ca   :  { %79 = vadd.xlane.f32.xlu1 %v109_v50 }
 0x24f   :  { %v78_v51 = vpop.xlane.xlu1 %77 }
 0x250   :  { %110 = vlog2.f32 %v78_v51 }
 0x253   :  { %v80_v52 = vpop.xlane.xlu1 %79 }
 0x254   :  { %112 = vlog2.f32 %v80_v52 }
 0x25d   :  { %v111_v53 = vpop.eup %110 }
 0x25e   :  { %v82_v54 = vmul.f32 0.6931472, %v111_v53 }
 0x260   :  { %v85_v56 = vadd.f32 %v82_v54, %v68_v43 }
 0x261   :  { %v113_v57 = vpop.eup %112 }
 0x262   :  { %v89_v58 = vsub.f32 %v85_v56, %v87_v55  ;;  %v84_v59 = vmul.f32 0.6931472, %v113_v57 }
 0x264   :  { %92 = vst.msk [vmem:[%s154_s2] sm:$0xff] %vm91_vm8, %v89_v58  ;;  %v86_v61 = vadd.f32 %v84_v59, %v70_v46 }
 0x266   :  { %v90_v62 = vsub.f32 %v86_v61, %v88_v60 }
 0x268   :  { %93 = vst.msk [vmem:[%s154_s2 + $0x8] sm:$0xff] %vm91_vm8, %v90_v62 }

</bundles_post_ra>
